<compile_context>
chip_gen: v5e
topology: v5e:2x2
jax: 0.10.0
libtpu: 0.0.40
codegen_flags: <defaults>
</compile_context>

<pallas_src>
import math

import jax
import jax.numpy as jnp
from jax.experimental import pallas as pl
from jax.experimental.pallas import tpu as pltpu


def _round_up(x: int, m: int) -> int:
    return ((x + m - 1) // m) * m


# ----------------------------------------------------------------------------
# Kernels
# ----------------------------------------------------------------------------
def _ff_kernel_resident(x_ref, w1_ref, b1_ref, w2_ref, b2_ref, o_ref):
    """Single-H-step path: whole W1/W2 grid-resident, no f32 accumulator RMW.

    Computes  o = GELU(x @ W1 + b1) @ W2 + b2  for one (tile_m, D_p) row tile.
    Dropout(0.1) is identity in eval mode, so nothing is emitted for it.
    """
    h = jnp.dot(x_ref[...], w1_ref[...], preferred_element_type=jnp.float32)
    # tanh GELU -> EUP slot (idle next to the MXU); erf-vs-tanh delta is below
    # the bf16 MXU noise already accepted by this kernel's numerical contract.
    h = jax.nn.gelu(h + b1_ref[...], approximate=True)
    o = jnp.dot(h.astype(jnp.bfloat16), w2_ref[...],
                preferred_element_type=jnp.float32)
    o_ref[...] = (o + b2_ref[...]).astype(o_ref.dtype)


def _ff_kernel_streamed(x_ref, w1_ref, b1_ref, w2_ref, b2_ref, o_ref, acc_ref):
    """H-tiled path: H is the N axis of matmul-1 and the K (reduction) axis of
    matmul-2, accumulated into an f32 VMEM scratch across grid axis 1."""
    j = pl.program_id(1)

    @pl.when(j == 0)
    def _init():
        acc_ref[...] = jnp.zeros_like(acc_ref)

    h = jnp.dot(x_ref[...], w1_ref[...], preferred_element_type=jnp.float32)
    h = jax.nn.gelu(h + b1_ref[...], approximate=True)
    acc_ref[...] += jnp.dot(h.astype(jnp.bfloat16), w2_ref[...],
                            preferred_element_type=jnp.float32)

    @pl.when(j == pl.num_programs(1) - 1)
    def _finalize():
        o_ref[...] = (acc_ref[...] + b2_ref[...]).astype(o_ref.dtype)


# ----------------------------------------------------------------------------
# Planning (generation-aware VMEM budgets, residency, tiling)
# ----------------------------------------------------------------------------
def _vmem_caps():
    """(compiler vmem limit, planning budget) derived from the chip's VMEM."""
    try:
        cap = int(pltpu.get_tpu_info().vmem_capacity_bytes)
    except Exception:
        cap = 64 * 1024 * 1024          # conservative default (v7x per-core VMEM)
    cap = max(cap, 32 * 1024 * 1024)
    # ~80% as the compiler limit (headroom for Mosaic internal scratch),
    # ~65% as the planning budget for our own tiles/buffers.
    return int(cap * 0.8), int(cap * 0.65)


def _pick_tile_h(d_p: int, h_p: int, tile_m: int, budget_bytes: int) -> int:
    """Largest tile_h (256-aligned when possible, dividing H_p) whose streamed,
    double-buffered bf16 W1/W2 slices + f32 intermediate fit budget_bytes."""
    granule = 256 if h_p % 256 == 0 else 128   # 256-wide MXU on v6e/v7x
    # per unit of tile_h: 2 bufs * (W1 col + W2 row) * bf16  +  f32+bf16 `h`
    per_col = 2 * 2 * 2 * d_p + tile_m * 6
    q = h_p // granule
    for d in range(q, 0, -1):
        if q % d:
            continue
        th = granule * d
        if th * per_col <= budget_bytes:
            return th
    return granule


def _plan_tiles(M: int, d_p: int, h_p: int, out_itemsize: int, budget: int):
    """Choose (tile_m, M_p, tile_h). tile_h == h_p means grid-resident weights."""

    def act_bytes(tm, with_acc):
        b = 2 * tm * d_p * 2                 # x block, bf16, double-buffered
        b += 2 * tm * d_p * out_itemsize     # out block, double-buffered
        if with_acc:
            b += tm * d_p * 4                # f32 accumulator scratch
        return b

    bias_bytes = 2 * (h_p + d_p) * 4
    # Double-buffered bf16 W1 + W2 when fully resident.
    # TODO(synk): pipeline_mode=pl.Buffered(1) on the resident weight specs
    # would drop the unused second buffer; omitted for cross-version safety.
    w_resident = 2 * (2 * d_p * h_p * 2) + bias_bytes

    # --- tile_m ------------------------------------------------------------
    target = 512
    if w_resident + act_bytes(512, False) + 512 * h_p * 6 > budget:
        # Weights cannot be resident: re-stream traffic scales as 1/tile_m,
        # so push tile_m up while activations still leave half the budget.
        if act_bytes(1024, True) <= budget // 2:
            target = 1024
    n_tiles = max(1, -(-M // target))
    if n_tiles == 1 and M >= 32:
        n_tiles = 2                          # >=2 row tiles keeps both v7x TCs busy
    tile_m = _round_up(-(-M // n_tiles), 16)  # 16 rows = natural bf16 sublane pack
    while tile_m > 128 and act_bytes(tile_m, True) > budget // 2:
        tile_m = max(128, _round_up(tile_m // 2, 16))
    m_pad = _round_up(M, tile_m)

    # --- tile_h / residency --------------------------------------------------
    resident = (w_resident + act_bytes(tile_m, False) + tile_m * h_p * 6) <= budget
    if resident:
        tile_h = h_p
    else:
        w_budget = budget - act_bytes(tile_m, True) - bias_bytes
        tile_h = _pick_tile_h(d_p, h_p, tile_m, max(w_budget, 0))

    return tile_m, m_pad, tile_h


# ----------------------------------------------------------------------------
# Forward wrapper
# ----------------------------------------------------------------------------
def prepare_general_ff_params(w1, b1, w2, b2):
    """Pad (lanes to multiples of 128) and cast weights ONCE — hoisted out of
    the per-call forward path. Zero padding is mathematically exact here."""
    D, H = int(w1.shape[0]), int(w1.shape[1])
    assert w1.shape == (D, H) and b1.shape == (H,)
    assert w2.shape == (H, D) and b2.shape == (D,)
    D_p, H_p = _round_up(D, 128), _round_up(H, 128)
    if (D, H) == (D_p, H_p):
        w1_p = w1.astype(jnp.bfloat16)
        w2_p = w2.astype(jnp.bfloat16)
    else:
        w1_p = jnp.zeros((D_p, H_p), jnp.bfloat16).at[:D, :H].set(w1.astype(jnp.bfloat16))
        w2_p = jnp.zeros((H_p, D_p), jnp.bfloat16).at[:H, :D].set(w2.astype(jnp.bfloat16))
    b1_p = jnp.zeros((1, H_p), jnp.float32).at[0, :H].set(b1.astype(jnp.float32))
    b2_p = jnp.zeros((1, D_p), jnp.float32).at[0, :D].set(b2.astype(jnp.float32))
    return (w1_p, b1_p, w2_p, b2_p), (D, H)


def _ff_forward_padded(x, w1_p, b1_p, w2_p, b2_p, D, H,
                       tile_m_hint=None, tile_h_hint=None):
    """Core forward on pre-padded/cast (bf16) weights."""
    orig_shape = x.shape
    out_dtype = x.dtype
    assert orig_shape[-1] == D
    D_p, H_p = int(w1_p.shape[0]), int(w1_p.shape[1])

    x2 = x.reshape(-1, D)
    M = int(x2.shape[0])
    out_itemsize = jnp.dtype(out_dtype).itemsize

    vmem_limit, plan_budget = _vmem_caps()
    tile_m, M_p, tile_h = _plan_tiles(M, D_p, H_p, out_itemsize, plan_budget)

    # Optional static hints (used by tests to force specific grid paths).
    if tile_m_hint is not None:
        tile_m = max(16, (int(tile_m_hint) // 16) * 16)
        M_p = _round_up(M, tile_m)
    if tile_h_hint is not None:
        th = max(128, (int(tile_h_hint) // 128) * 128)
        if H_p % th == 0:
            tile_h = th

    m_steps = M_p // tile_m
    h_steps = H_p // tile_h

    # Cast x once to bf16 for the MXU; pad only when actually needed.
    x_bf = x2.astype(jnp.bfloat16)
    if (M_p, D_p) != (M, D):
        x_bf = jnp.zeros((M_p, D_p), jnp.bfloat16).at[:M, :D].set(x_bf)

    w_bytes = 2 * D_p * H_p * 2                       # bf16 W1 + W2
    weight_fetches = 1 if h_steps == 1 else m_steps   # resident vs re-streamed
    cost = pl.CostEstimate(
        flops=4 * M_p * D_p * H_p,                    # two matmuls
        transcendentals=M_p * H_p,                    # tanh in GELU
        bytes_accessed=(M_p * D_p * 2                 # x (bf16)
                        + weight_fetches * w_bytes    # W1, W2
                        + (H_p + D_p) * 4             # biases (f32)
                        + M_p * D_p * out_itemsize),  # output
    )

    if h_steps == 1:
        # Grid-resident weights: constant index_maps -> each weight DMA'd once
        # for the entire kernel; no f32 accumulator / RMW / pl.when overhead.
        grid_spec = pltpu.PrefetchScalarGridSpec(
            num_scalar_prefetch=0,
            grid=(m_steps,),
            in_specs=[
                pl.BlockSpec((tile_m, D_p), lambda i: (i, 0)),   # x rows
                pl.BlockSpec((D_p, H_p), lambda i: (0, 0)),      # W1 (resident)
                pl.BlockSpec((1, H_p), lambda i: (0, 0)),        # b1
                pl.BlockSpec((H_p, D_p), lambda i: (0, 0)),      # W2 (resident)
                pl.BlockSpec((1, D_p), lambda i: (0, 0)),        # b2
            ],
            out_specs=pl.BlockSpec((tile_m, D_p), lambda i: (i, 0)),
        )
        kernel = _ff_kernel_resident
        dim_sem = ("parallel",)
    else:
        grid_spec = pltpu.PrefetchScalarGridSpec(
            num_scalar_prefetch=0,
            grid=(m_steps, h_steps),
            in_specs=[
                pl.BlockSpec((tile_m, D_p), lambda i, j: (i, 0)),   # x rows
                pl.BlockSpec((D_p, tile_h), lambda i, j: (0, j)),   # W1 (H-tiled)
                pl.BlockSpec((1, tile_h), lambda i, j: (0, j)),     # b1 slice
                pl.BlockSpec((tile_h, D_p), lambda i, j: (j, 0)),   # W2 (K-tiled)
                pl.BlockSpec((1, D_p), lambda i, j: (0, 0)),        # b2
            ],
            out_specs=pl.BlockSpec((tile_m, D_p), lambda i, j: (i, 0)),
            scratch_shapes=[pltpu.VMEM((tile_m, D_p), jnp.float32)],  # f32 acc
        )
        kernel = _ff_kernel_streamed
        dim_sem = ("parallel", "arbitrary")

    out_p = pl.pallas_call(
        kernel,
        out_shape=jax.ShapeDtypeStruct((M_p, D_p), out_dtype),
        grid_spec=grid_spec,
        compiler_params=pltpu.CompilerParams(
            dimension_semantics=dim_sem,
            vmem_limit_bytes=vmem_limit,
        ),
        cost_estimate=cost,
    )(x_bf, w1_p, b1_p, w2_p, b2_p)

    if (M_p, D_p) != (M, D):
        out_p = out_p[:M, :D]
    return out_p.reshape(orig_shape)


def make_general_ff(w1, b1, w2, b2):
    """Prepare (pad + cast) weights once and return a jitted forward(x) closure."""
    prepared, (D, H) = prepare_general_ff_params(w1, b1, w2, b2)

    @jax.jit
    def _fwd(x, w1_p, b1_p, w2_p, b2_p):
        return _ff_forward_padded(x, w1_p, b1_p, w2_p, b2_p, D, H)

    def forward(x):
        return _fwd(x, *prepared)

    return forward


def specialization_guided_ff_general(x, w1, b1, w2, b2, *,
                                     tile_m_hint=None, tile_h_hint=None):
    """One-shot convenience path (pads per call; prefer make_general_ff for reuse)."""
    (w1_p, b1_p, w2_p, b2_p), (D, H) = prepare_general_ff_params(w1, b1, w2, b2)
    return _ff_forward_padded(x, w1_p, b1_p, w2_p, b2_p, D, H,
                              tile_m_hint=tile_m_hint, tile_h_hint=tile_h_hint)


# ----------------------------------------------------------------------------
# Init + references
# ----------------------------------------------------------------------------
def init_general_processor_params(key, model_dim):
    """Deterministic init mirroring nn.Linear defaults (kaiming-uniform-like)."""
    D, H = model_dim, 2 * model_dim
    k1, k2, k3, k4 = jax.random.split(key, 4)
    bound1 = 1.0 / math.sqrt(D)
    bound2 = 1.0 / math.sqrt(H)
    w1 = jax.random.uniform(k1, (D, H), jnp.float32, -bound1, bound1)
    b1 = jax.random.uniform(k2, (H,), jnp.float32, -bound1, bound1)
    w2 = jax.random.uniform(k3, (H, D), jnp.float32, -bound2, bound2)
    b2 = jax.random.uniform(k4, (D,), jnp.float32, -bound2, bound2)
    return w1, b1, w2, b2


def _ref_bf16(x, w1, b1, w2, b2):
    """Pure-JAX reference mirroring the kernel's bf16-operand / f32-acc /
    tanh-GELU math (the kernel's stated numerical contract)."""
    D = x.shape[-1]
    x2 = x.reshape(-1, D)
    h = jnp.dot(x2.astype(jnp.bfloat16), w1.astype(jnp.bfloat16),
                preferred_element_type=jnp.float32) + b1
    h = jax.nn.gelu(h, approximate=True)
    o = jnp.dot(h.astype(jnp.bfloat16), w2.astype(jnp.bfloat16),
                preferred_element_type=jnp.float32) + b2
    return o.reshape(x.shape).astype(x.dtype)


if __name__ == "__main__":
    key = jax.random.PRNGKey(0)
    batch, seq, model_dim = 2, 8, 32   # splat_state: (batch, seq, model_dim)

    kx, kp = jax.random.split(key)
    splat_state = jax.random.normal(kx, (batch, seq, model_dim), jnp.float32)
    w1, b1, w2, b2 = init_general_processor_params(kp, model_dim)

    forward = make_general_ff(w1, b1, w2, b2)   # weights padded/cast once, jitted
    out = jax.block_until_ready(forward(splat_state))

    # Check 1: bf16-matched (tanh-GELU) JAX reference — same MXU dtypes as kernel.
    ref = _ref_bf16(splat_state, w1, b1, w2, b2)
    assert jnp.allclose(out, ref, atol=1e-2, rtol=1e-2), \
        float(jnp.max(jnp.abs(out - ref)))

    # Check 2: full-f32 erf-GELU PyTorch-parity sanity (bf16 MXU + tanh GELU
    # are the accepted numerical contract => loose tolerance).
    ref32 = (jax.nn.gelu(splat_state.reshape(-1, model_dim) @ w1 + b1,
                         approximate=False) @ w2 + b2
             ).reshape(batch, seq, model_dim)
    assert jnp.allclose(out, ref32, atol=1e-1, rtol=1e-1)

    # Check 3: larger shape, default plan (grid-resident weights, >=2 row tiles).
    kb, kw = jax.random.split(jax.random.PRNGKey(1))
    xb = jax.random.normal(kb, (4, 160, 256), jnp.float32)        # M = 640
    pw1, pb1, pw2, pb2 = init_general_processor_params(kw, 256)   # H = 512
    out_res = jax.block_until_ready(
        specialization_guided_ff_general(xb, pw1, pb1, pw2, pb2))
    ref_big = _ref_bf16(xb, pw1, pb1, pw2, pb2)
    assert jnp.allclose(out_res, ref_big, atol=2e-2, rtol=2e-2), \
        float(jnp.max(jnp.abs(out_res - ref_big)))

    # Check 4: force the streamed H-reduction path (f32 accumulator + pl.when).
    out_str = jax.block_until_ready(
        specialization_guided_ff_general(xb, pw1, pb1, pw2, pb2,
                                         tile_m_hint=256, tile_h_hint=128))
    assert jnp.allclose(out_str, ref_big, atol=2e-2, rtol=2e-2), \
        float(jnp.max(jnp.abs(out_str - ref_big)))

    # Effectiveness bookkeeping (side statistic only; does not affect output).
    _effectiveness = float(jnp.linalg.norm(out)) / (float(jnp.linalg.norm(splat_state)) + 1e-8)

    # TODO(synk): training-mode Dropout(0.1) (RNG mask) and the other SplatRole
    # processors (SEMANTICS trailing LayerNorm, TEMPORAL gating, etc.) are not
    # instantiated here; GENERAL is the module's default branch in eval mode.

    print("KERNEL_OK")
</pallas_src>

<mosaic_0001>
module attributes {stable_mosaic.version = 11 : i64} {
  func.func @_ff_kernel_resident(%arg0: i32, %arg1: memref<16x128xbf16, #tpu.memory_space<vmem>>, %arg2: memref<128x128xbf16, #tpu.memory_space<vmem>>, %arg3: memref<1x128xf32, #tpu.memory_space<vmem>>, %arg4: memref<128x128xbf16, #tpu.memory_space<vmem>>, %arg5: memref<1x128xf32, #tpu.memory_space<vmem>>, %arg6: memref<16x128xf32, #tpu.memory_space<vmem>>) attributes {dimension_semantics = [#tpu.dimension_semantics<parallel>], iteration_bounds = array<i64: 1>, scalar_prefetch = 0 : i64, scratch_operands = 0 : i64, tpu.core_type = #tpu.core_type<tc>, window_params = [{transform_indices = @transform_0, window_bounds = array<i64: 16, 128>}, {pipeline_mode = #tpu.pipeline_mode<synchronous>, transform_indices = @transform_1, window_bounds = array<i64: 128, 128>}, {pipeline_mode = #tpu.pipeline_mode<synchronous>, transform_indices = @transform_2, window_bounds = array<i64: 1, 128>}, {pipeline_mode = #tpu.pipeline_mode<synchronous>, transform_indices = @transform_3, window_bounds = array<i64: 128, 128>}, {pipeline_mode = #tpu.pipeline_mode<synchronous>, transform_indices = @transform_4, window_bounds = array<i64: 1, 128>}, {transform_indices = @transform_5, window_bounds = array<i64: 16, 128>}]} {
    %c0 = arith.constant 0 : index
    %c0_0 = arith.constant 0 : index
    %0 = vector.load %arg1[%c0, %c0_0] : memref<16x128xbf16, #tpu.memory_space<vmem>>, vector<16x128xbf16>
    %c0_1 = arith.constant 0 : index
    %c0_2 = arith.constant 0 : index
    %1 = vector.load %arg2[%c0_1, %c0_2] : memref<128x128xbf16, #tpu.memory_space<vmem>>, vector<128x128xbf16>
    %cst = arith.constant dense<0.000000e+00> : vector<16x128xf32>
    %2 = tpu.matmul %0, %1, %cst {dimension_numbers = #tpu.dot_dimension_numbers<[1], [0], [0], [1], [0, 0, 1, 1], [], []>} : vector<16x128xbf16>, vector<128x128xbf16>, vector<16x128xf32> -> vector<16x128xf32>
    %c0_3 = arith.constant 0 : index
    %c0_4 = arith.constant 0 : index
    %3 = vector.load %arg3[%c0_3, %c0_4] : memref<1x128xf32, #tpu.memory_space<vmem>>, vector<1x128xf32>
    %4 = vector.broadcast %3 : vector<1x128xf32> to vector<16x128xf32>
    %5 = arith.addf %2, %4 : vector<16x128xf32>
    %6 = arith.mulf %5, %5 : vector<16x128xf32>
    %7 = arith.mulf %5, %6 : vector<16x128xf32>
    %cst_5 = arith.constant 4.471500e-02 : f32
    %8 = vector.broadcast %cst_5 : f32 to vector<16x128xf32>
    %9 = arith.mulf %8, %7 : vector<16x128xf32>
    %10 = arith.addf %5, %9 : vector<16x128xf32>
    %cst_6 = arith.constant 0.797884583 : f32
    %11 = vector.broadcast %cst_6 : f32 to vector<16x128xf32>
    %12 = arith.mulf %11, %10 : vector<16x128xf32>
    %13 = math.tanh %12 : vector<16x128xf32>
    %cst_7 = arith.constant 1.000000e+00 : f32
    %14 = vector.broadcast %cst_7 : f32 to vector<16x128xf32>
    %15 = arith.addf %14, %13 : vector<16x128xf32>
    %cst_8 = arith.constant 5.000000e-01 : f32
    %16 = vector.broadcast %cst_8 : f32 to vector<16x128xf32>
    %17 = arith.mulf %16, %15 : vector<16x128xf32>
    %18 = arith.mulf %5, %17 : vector<16x128xf32>
    %19 = arith.truncf %18 : vector<16x128xf32> to vector<16x128xbf16>
    %c0_9 = arith.constant 0 : index
    %c0_10 = arith.constant 0 : index
    %20 = vector.load %arg4[%c0_9, %c0_10] : memref<128x128xbf16, #tpu.memory_space<vmem>>, vector<128x128xbf16>
    %cst_11 = arith.constant dense<0.000000e+00> : vector<16x128xf32>
    %21 = tpu.matmul %19, %20, %cst_11 {dimension_numbers = #tpu.dot_dimension_numbers<[1], [0], [0], [1], [0, 0, 1, 1], [], []>} : vector<16x128xbf16>, vector<128x128xbf16>, vector<16x128xf32> -> vector<16x128xf32>
    %c0_12 = arith.constant 0 : index
    %c0_13 = arith.constant 0 : index
    %22 = vector.load %arg5[%c0_12, %c0_13] : memref<1x128xf32, #tpu.memory_space<vmem>>, vector<1x128xf32>
    %23 = vector.broadcast %22 : vector<1x128xf32> to vector<16x128xf32>
    %24 = arith.addf %21, %23 : vector<16x128xf32>
    %c0_14 = arith.constant 0 : index
    %c0_15 = arith.constant 0 : index
    %25 = vector.load %arg6[%c0_14, %c0_15] : memref<16x128xf32, #tpu.memory_space<vmem>>, vector<16x128xf32>
    tpu.vector_store %arg6[%c0_14, %c0_15], %24 {strides = array<i32>} : memref<16x128xf32, #tpu.memory_space<vmem>>, vector<16x128xf32>,
    return
  }
  func.func @transform_0(%arg0: i32) -> (i32, i32) {
    %c0_i32 = arith.constant 0 : i32
    %c0_i32_0 = arith.constant 0 : i32
    return %arg0, %c0_i32 : i32, i32
  }
  func.func @transform_1(%arg0: i32) -> (i32, i32) {
    %c0_i32 = arith.constant 0 : i32
    %c0_i32_0 = arith.constant 0 : i32
    %c0_i32_1 = arith.constant 0 : i32
    return %c0_i32, %c0_i32_0 : i32, i32
  }
  func.func @transform_2(%arg0: i32) -> (i32, i32) {
    %c0_i32 = arith.constant 0 : i32
    %c0_i32_0 = arith.constant 0 : i32
    %c0_i32_1 = arith.constant 0 : i32
    return %c0_i32, %c0_i32_0 : i32, i32
  }
  func.func @transform_3(%arg0: i32) -> (i32, i32) {
    %c0_i32 = arith.constant 0 : i32
    %c0_i32_0 = arith.constant 0 : i32
    %c0_i32_1 = arith.constant 0 : i32
    return %c0_i32, %c0_i32_0 : i32, i32
  }
  func.func @transform_4(%arg0: i32) -> (i32, i32) {
    %c0_i32 = arith.constant 0 : i32
    %c0_i32_0 = arith.constant 0 : i32
    %c0_i32_1 = arith.constant 0 : i32
    return %c0_i32, %c0_i32_0 : i32, i32
  }
  func.func @transform_5(%arg0: i32) -> (i32, i32) {
    %c0_i32 = arith.constant 0 : i32
    %c0_i32_0 = arith.constant 0 : i32
    return %arg0, %c0_i32 : i32, i32
  }
}

</mosaic_0001>

<bundles_post_ra>
// kernel: _fwd.1
= control target key start
LH: loop header
LB: loop body
LE: loop exit
PB: predicated region body
PF: predicated region fallthrough
CT: control target
= control target key end

     0   :  { %10 = vsyncpa [#allocation3], 0  ;;  %s453_s0 = inlined_call_operand.vmem [shape: bf16[16,128], index: 0, kind: input, shape index: {}]   ;;  %s454_s1 = inlined_call_operand.hbm [shape: bf16[128,128], index: 1, kind: input, shape index: {}]   ;;  %s455_s2 = inlined_call_operand.vmem [shape: f32[1,128], index: 2, kind: input, shape index: {}]   ;;  %s456_s3 = inlined_call_operand.hbm [shape: bf16[128,128], index: 3, kind: input, shape index: {}]   ;;  %s457_s4 = inlined_call_operand.vmem [shape: f32[1,128], index: 4, kind: input, shape index: {}]   ;;  %s458_s5 = inlined_call_operand.vmem [shape: f32[16,128], index: 5, kind: output, shape index: {}]  }
   0x1   :  { %s18_s20 = sshll.u32 %s454_s1, 4  ;;  %s19_s20 = int_to_ptr.hbm [resolvable:$true] %s18_s20 }
   0x2   :  { %11 = vsyncpa [#allocation5], 0  ;;  %s398_s21 = smov [#allocation2]   ;;  %s33_s25 = sshll.u32 %s456_s3, 4  ;;  %s34_s25 = int_to_ptr.hbm [resolvable:$true] %s33_s25 }
   0x3   :  { %s20_s22 = sshll.u32 %s398_s21, 4  ;;  %s399_s26 = smov 64   ;;  %s21_s22 = int_to_ptr.vmem [resolvable:$true] %s20_s22 }
   0x4   :  { %s400_s27 = smov 4   ;;  %s401_s28 = smov [#allocation4]  }
   0x5   :  { %26 = dma.hbm_to_vmem [thread:$0]  %s19_s20, 1024, %s21_s22, [#allocation3], %s399_s26, %s399_s26, %s400_s27  }
   0x6   :  { %s35_s29 = sshll.u32 %s401_s28, 4  ;;  %s36_s29 = int_to_ptr.vmem [resolvable:$true] %s35_s29 }
   0x7   :  { %41 = dma.hbm_to_vmem [thread:$0]  %s34_s25, 1024, %s36_s29, [#allocation5], %s399_s26, %s399_s26, %s400_s27  }
   0x8   :  { %394 = dma.done.wait [#allocation3], 1024  }
   0x9   :  { %395 = vsyncadd [#allocation3], 4294966272 }
   0xa   :  { %396 = dma.done.wait [#allocation5], 1024  }
   0xb   :  { %397 = vsyncadd [#allocation5], 4294966272  ;;  %v327_v0 = vld [vmem:[#allocation2 + $0x38] sm:$0xff]  ;;  %v326_v1 = vld [vmem:[#allocation2 + $0x30] sm:$0xff] }
   0xc   :  { %128 = vmatpush.bf16.msra.mxu0 %v327_v0  ;;  %v325_v2 = vld [vmem:[#allocation2 + $0x28] sm:$0xff]  ;;  %v324_v3 = vld [vmem:[#allocation2 + $0x20] sm:$0xff]  ;;  %v323_v4 = vld [vmem:[#allocation2 + $0x18] sm:$0xff] }
   0xd   :  { %v322_v5 = vld [vmem:[#allocation2 + $0x10] sm:$0xff]  ;;  %v321_v6 = vld [vmem:[#allocation2 + $0x8] sm:$0xff]  ;;  %v320_v7 = vld [vmem:[#allocation2] sm:$0xff] }
   0xe   :  { %v319_v8 = vld [vmem:[%s453_s0] sm:$0xff]  ;;  %v335_v9 = vld [vmem:[#allocation4 + $0x38] sm:$0xff]  ;;  %v334_v10 = vld [vmem:[#allocation4 + $0x30] sm:$0xff] }
   0xf   :  { %229 = vmatpush.bf16.msra.mxu1 %v335_v9  ;;  %v333_v11 = vld [vmem:[#allocation4 + $0x28] sm:$0xff]  ;;  %v332_v12 = vld [vmem:[#allocation4 + $0x20] sm:$0xff]  ;;  %v331_v13 = vld [vmem:[#allocation4 + $0x18] sm:$0xff] }
  0x10   :  { %129 = vmatpush.bf16.msra.mxu0 %v326_v1  ;;  %v330_v14 = vld [vmem:[#allocation4 + $0x10] sm:$0xff]  ;;  %v329_v15 = vld [vmem:[#allocation4 + $0x8] sm:$0xff]  ;;  %v340_v16 = vld [vmem:[%s455_s2] ss:$0 sm:$0xff] }
  0x11   :  { %v328_v17 = vld [vmem:[#allocation4] sm:$0xff] }
  0x12   :  { %v341_v41 = vld [vmem:[%s457_s4] ss:$0 sm:$0xff] }
  0x13   :  { %230 = vmatpush.bf16.msra.mxu1 %v334_v10 }
  0x14   :  { %130 = vmatpush.bf16.msra.mxu0 %v325_v2 }
  0x17   :  { %231 = vmatpush.bf16.msra.mxu1 %v333_v11 }
  0x18   :  { %131 = vmatpush.bf16.msra.mxu0 %v324_v3 }
  0x1b   :  { %232 = vmatpush.bf16.msra.mxu1 %v332_v12 }
  0x1c   :  { %132 = vmatpush.bf16.msra.mxu0 %v323_v4 }
  0x1f   :  { %233 = vmatpush.bf16.msra.mxu1 %v331_v13 }
  0x20   :  { %133 = vmatpush.bf16.msra.mxu0 %v322_v5 }
  0x23   :  { %234 = vmatpush.bf16.msra.mxu1 %v330_v14 }
  0x24   :  { %134 = vmatpush.bf16.msra.mxu0 %v321_v6 }
  0x27   :  { %235 = vmatpush.bf16.msra.mxu1 %v329_v15 }
  0x28   :  { %135 = vmatpush.bf16.msra.mxu0 %v320_v7 }
  0x2b   :  { %136 = vmatmul.bf16.vlgmr.msra.gmra.mxu0 %v319_v8  ;;  %236 = vmatpush.bf16.msra.mxu1 %v328_v17 }
  0xa8   :  { %v137_v18 = vpop.f32.mrf.mxu0 }
  0xa9   :  { %v138_v19 = vadd.f32 %v340_v16, %v137_v18 }
  0xab   :  { %v142_v20 = vmul.f32 %v138_v19, %v138_v19 }
  0xad   :  { %v144_v21 = vmul.f32 %v142_v20, %v138_v19 }
  0xaf   :  { %v146_v22 = vmul.f32 0.044715, %v144_v21 }
  0xb0   :  { %v139_v23 = vpop.f32.mrf.mxu0 }
  0xb1   :  { %v148_v24 = vadd.f32 %v146_v22, %v138_v19  ;;  %v140_v25 = vadd.f32 %v340_v16, %v139_v23 }
  0xb3   :  { %v143_v26 = vmul.f32 %v140_v25, %v140_v25  ;;  %v150_v27 = vmul.f32 0.7978846, %v148_v24 }
  0xb5   :  { %v145_v28 = vmul.f32 %v143_v26, %v140_v25  ;;  %342 = vtanh.f32 %v150_v27 }
  0xb7   :  { %v147_v29 = vmul.f32 0.044715, %v145_v28 }
  0xb9   :  { %v149_v30 = vadd.f32 %v147_v29, %v140_v25 }
  0xbb   :  { %v151_v31 = vmul.f32 0.7978846, %v149_v30  ;;  %v343_v32 = vpop.eup %342 }
  0xbc   :  { %v154_v33 = vadd.f32 1.0, %v343_v32 }
  0xbd   :  { %344 = vtanh.f32 %v151_v31 }
  0xbe   :  { %v156_v36 = vmul.f32 0.5, %v154_v33 }
  0xc0   :  { %v158_v38 = vmul.f32 %v156_v36, %v138_v19 }
  0xc3   :  { %v345_v34 = vpop.eup %344 }
  0xc4   :  { %v155_v35 = vadd.f32 1.0, %v345_v34 }
  0xc6   :  { %v157_v37 = vmul.f32 0.5, %v155_v35 }
  0xc8   :  { %v159_v39 = vmul.f32 %v157_v37, %v140_v25 }
  0xca   :  { %v160_v40 = vpack.c.bf16 %v159_v39, %v158_v38 }
  0xcc   :  { %237 = vmatmul.bf16.vlgmr.msra.gmra.mxu1 %v160_v40 }
 0x149   :  { %v238_v42 = vpop.f32.mrf.mxu1 }
 0x14a   :  { %v239_v43 = vadd.f32 %v341_v41, %v238_v42 }
 0x14c   :  { %243 = vst [vmem:[%s458_s5] sm:$0xff] %v239_v43 }
 0x151   :  { %v240_v44 = vpop.f32.mrf.mxu1 }
 0x152   :  { %v241_v45 = vadd.f32 %v341_v41, %v240_v44 }
 0x154   :  { %244 = vst [vmem:[%s458_s5 + $0x8] sm:$0xff] %v241_v45 }
 0x155   :  { %249 = vsyncpa [#allocation3], 1 }
 0x156   :  { %250 = vsyncpa [#allocation5], 1 }

</bundles_post_ra>
